<compile_context>
chip_gen: v7x
topology: tpu7x:2x2x1
jax: 0.10.0
libtpu: 0.0.40
codegen_flags: <defaults>
</compile_context>

<pallas_src>
import jax
import jax.numpy as jnp
from jax.experimental import pallas as pl
from jax.experimental.pallas import tpu as pltpu


POOL_SIZES = (1, 2, 3, 6)
_HIGH = jax.lax.Precision.HIGHEST


# ---------------------------------------------------------------------------
# Pallas kernel: fused (upsampled branches -> concat -> final 1x1 conv)
# ---------------------------------------------------------------------------
def psp_kernel(x_ref, basis_ref, a_ref, w2_ref, out_ref):
    # x_ref     : (1, C,  TS)  spatial tile of x (channels on sublanes, spatial on lanes)
    # basis_ref : (Kt, TS)     bilinear interpolation basis tile (data-independent)
    # a_ref     : (1, Co, Kt)  per-image folded branch matrix (conv bias folded in)
    # w2_ref    : (Co, C)      final-conv weights acting on the identity path
    # out_ref   : (1, Co, TS)
    branch = jnp.dot(a_ref[0], basis_ref[...],
                     preferred_element_type=jnp.float32)        # (Co, TS)
    direct = jnp.dot(w2_ref[...], x_ref[0],
                     preferred_element_type=jnp.float32)        # (Co, TS)
    out_ref[0] = (branch + direct).astype(out_ref.dtype)


# ---------------------------------------------------------------------------
# Small data-independent basis constructions (trace-time Python loops)
# ---------------------------------------------------------------------------
def _pool_matrix(s, L):
    """Adaptive-avg-pool row weights, shape (s, L); row i averages its bin."""
    rows = []
    for i in range(s):
        lo = (i * L) // s
        hi = -((-(i + 1) * L) // s)
        rows.append(jnp.zeros((L,), jnp.float32).at[lo:hi].set(1.0 / (hi - lo)))
    return jnp.stack(rows)                                       # (s, L)


def _pool_basis(H, W):
    """All adaptive pools as one matrix, shape (H*W, sum s^2)."""
    cols = []
    for s in POOL_SIZES:
        ph = _pool_matrix(s, H)                                  # (s, H)
        pw = _pool_matrix(s, W)                                  # (s, W)
        cols.append(jnp.einsum('ih,jw->hwij', ph, pw).reshape(H * W, s * s))
    return jnp.concatenate(cols, axis=1)                         # (HW, Kt)


def _interp_matrix(out_len, in_len):
    """Bilinear align_corners=True weights, shape (out_len, in_len)."""
    if in_len == 1:
        return jnp.ones((out_len, 1), jnp.float32)
    src = jnp.arange(out_len, dtype=jnp.float32) * (in_len - 1) / (out_len - 1)
    i0 = jnp.clip(jnp.floor(src).astype(jnp.int32), 0, in_len - 1)
    i1 = jnp.minimum(i0 + 1, in_len - 1)
    frac = src - i0.astype(jnp.float32)
    m = jnp.zeros((out_len, in_len), jnp.float32)
    idx = jnp.arange(out_len)
    m = m.at[idx, i0].add(1.0 - frac)
    m = m.at[idx, i1].add(frac)
    return m


def _interp_basis(H, W):
    """Stacked separable bilinear bases, shape (sum s^2, H*W)."""
    blocks = []
    for s in POOL_SIZES:
        uh = _interp_matrix(H, s)                                # (H, s)
        uw = _interp_matrix(W, s)                                # (W, s)
        blocks.append(jnp.einsum('hi,wj->ijhw', uh, uw).reshape(s * s, H * W))
    return jnp.concatenate(blocks, axis=0)


# ---------------------------------------------------------------------------
# Tiny per-image glue math (branch conv / BN / ReLU on already-pooled values)
# ---------------------------------------------------------------------------
def _branch_features(pooled_all, branch_params):
    """ReLU(BN?(Conv1x1(pooled))) per branch -> list of (N, Cb, s*s)."""
    feats, off = [], 0
    for s, p in zip(POOL_SIZES, branch_params):
        ps = pooled_all[:, :, off:off + s * s]                   # (N, C, s*s)
        off += s * s
        y = jnp.einsum('oc,ncp->nop', p['w'], ps, precision=_HIGH)
        if p['bias'] is not None:
            y = y + p['bias'][None, :, None]
        if p['bn'] is not None:
            bn = p['bn']
            inv = jax.lax.rsqrt(bn['var'] + bn['eps'])
            y = (y - bn['mean'][None, :, None]) * (bn['gamma'] * inv)[None, :, None] \
                + bn['beta'][None, :, None]
        y = jax.nn.relu(y)
        feats.append(y)
    return feats


# ---------------------------------------------------------------------------
# Generation-aware tile / VMEM sizing
# ---------------------------------------------------------------------------
def _vmem_capacity_bytes():
    """Per-core VMEM capacity, with a conservative fallback (v7x = 64 MiB/TC)."""
    try:
        info = pltpu.get_tpu_info()
        cap = getattr(info, "vmem_capacity_bytes", None)
        if cap:
            return int(cap)
    except Exception:
        pass
    return 64 << 20


def _pick_spatial_tile(hw, n_batch, c_in, c_out, k_tot, stream_isz, out_isz, vmem_cap):
    """Spatial tile (lanes) for the streaming kernel."""
    if hw <= 512:
        return hw
    # Double-buffered allocations: streamed (x, basis, out) scale with ts;
    # a and w2 are grid-resident but still double-buffer-allocated by Pallas.
    resident = 2 * c_out * (k_tot + c_in) * stream_isz
    per_col = 2 * ((c_in + k_tot) * stream_isz + c_out * out_isz)
    budget = max(int(vmem_cap * 0.6) - resident, 2 << 20)
    ts = max(256, (budget // per_col) // 256 * 256)              # multiple of 256 (full MXU pass)
    if ts >= hw:
        ts = hw
    # Keep enough grid points so megacore sharding feeds both v7x TensorCores.
    while n_batch * pl.cdiv(hw, ts) < 8 and ts > 512:
        ts = max(256, ((ts // 2) // 256) * 256)
    return ts


# ---------------------------------------------------------------------------
# Wrapper
# ---------------------------------------------------------------------------
def psp_module_forward(x, branch_params, conv_w, conv_b, *,
                       tile_spatial=None, stream_dtype=None):
    """PSPModule forward.

    x             : (N, C, H, W) float32, NCHW
    branch_params : list (per pool size) of dicts {w:(Cb,C), bias:(Cb,)|None,
                    bn: None | {gamma,beta,mean,var,eps}}  (BN eval mode)
    conv_w        : (Co, 2C, 1, 1)  final 1x1 conv weight
    conv_b        : (Co,)           final 1x1 conv bias
    stream_dtype  : dtype for the streamed operands (bf16 on v6e/v7x halves HBM traffic)
    returns       : (N, Co, H, W)
    """
    N, C, H, W = x.shape
    assert C % len(POOL_SIZES) == 0
    assert POOL_SIZES[0] == 1        # bias fold relies on the all-ones s=1 basis row
    Cb = C // len(POOL_SIZES)
    Co = conv_w.shape[0]
    conv_w2d = conv_w.reshape(Co, 2 * C)
    HW = H * W
    Kt = sum(s * s for s in POOL_SIZES)                          # 50
    out_dtype = x.dtype
    sdtype = jnp.dtype(stream_dtype) if stream_dtype is not None else jnp.dtype(x.dtype)

    x_flat = x.reshape(N, C, HW)                                 # free reshape (contiguous)

    # --- all four adaptive pools in ONE pass over x (single matmul) ---------
    pool_basis = _pool_basis(H, W)                               # (HW, Kt)
    pooled_all = jnp.einsum('ncs,sk->nck', x_flat, pool_basis, precision=_HIGH)

    # --- tiny per-image branch math + folding into A[n]  (<= 50 cols) -------
    feats = _branch_features(pooled_all, branch_params)          # [(N, Cb, s*s)]
    a_blocks, off = [], 0
    for f in feats:
        wb = conv_w2d[:, off:off + Cb]                           # (Co, Cb)
        a_blocks.append(jnp.einsum('oc,ncp->nop', wb, f, precision=_HIGH))
        off += Cb
    a = jnp.concatenate(a_blocks, axis=2)                        # (N, Co, Kt)
    a = a.at[:, :, 0].add(conv_b)        # fold conv bias through the all-ones s=1 basis row
    w2 = conv_w2d[:, len(POOL_SIZES) * Cb:]                      # (Co, C) identity path
    basis = _interp_basis(H, W)                                  # (Kt, HW)

    # --- cast streamed operands (accumulation in the kernel stays f32) ------
    x_s = x_flat.astype(sdtype)
    basis_s = basis.astype(sdtype)
    a_s = a.astype(sdtype)
    w2_s = w2.astype(sdtype)

    s_isz = sdtype.itemsize
    o_isz = jnp.dtype(out_dtype).itemsize
    vmem_cap = _vmem_capacity_bytes()

    ts = tile_spatial if tile_spatial is not None else _pick_spatial_tile(
        HW, N, C, Co, Kt, s_isz, o_isz, vmem_cap)
    n_t = pl.cdiv(HW, ts)

    # Explicit VMEM budget: double-buffered streamed blocks + resident a/w2 + headroom.
    # TODO(synk): single-buffer w2/a via pipeline_mode=pl.Buffered(1) once verified stable.
    needed = (2 * ts * ((C + Kt) * s_isz + Co * o_isz)
              + 2 * Co * (Kt + C) * s_isz + (4 << 20))
    vmem_limit = int(min(max(needed, 32 << 20), vmem_cap - (4 << 20)))
    vmem_limit = int(max(vmem_limit, needed))

    cost = pl.CostEstimate(
        flops=2 * N * Co * (C + Kt) * HW,
        transcendentals=0,
        bytes_accessed=int(N * C * HW * s_isz + Kt * HW * s_isz
                           + N * Co * Kt * s_isz + Co * C * s_isz
                           + N * Co * HW * o_isz),
    )

    out_flat = pl.pallas_call(
        psp_kernel,
        out_shape=jax.ShapeDtypeStruct((N, Co, HW), out_dtype),
        grid_spec=pltpu.PrefetchScalarGridSpec(
            num_scalar_prefetch=0,
            # Spatial OUTER, batch INNER: the (Kt, ts) basis tile keeps the same
            # block index along the inner axis and stays VMEM-resident across images.
            grid=(n_t, N),
            in_specs=[
                pl.BlockSpec((1, C, ts), lambda t, n: (n, 0, t)),
                pl.BlockSpec((Kt, ts), lambda t, n: (0, t)),
                pl.BlockSpec((1, Co, Kt), lambda t, n: (n, 0, 0)),
                pl.BlockSpec((Co, C), lambda t, n: (0, 0)),
            ],
            out_specs=pl.BlockSpec((1, Co, ts), lambda t, n: (n, 0, t)),
        ),
        compiler_params=pltpu.CompilerParams(
            dimension_semantics=("parallel", "parallel"),
            vmem_limit_bytes=vmem_limit),
        cost_estimate=cost,
    )(x_s, basis_s, a_s, w2_s)

    return out_flat.reshape(N, Co, H, W)


# ---------------------------------------------------------------------------
# Pure-JAX reference mirroring the PyTorch forward op-by-op (NCHW)
# ---------------------------------------------------------------------------
def _adaptive_avg_pool(x, s):
    """PyTorch AdaptiveAvgPool2d((s, s)) on NCHW (exact bin formula)."""
    _, _, H, W = x.shape
    rows = []
    for i in range(s):
        h0, h1 = (i * H) // s, -((-(i + 1) * H) // s)
        cols = []
        for j in range(s):
            w0, w1 = (j * W) // s, -((-(j + 1) * W) // s)
            cols.append(jnp.mean(x[:, :, h0:h1, w0:w1], axis=(2, 3)))
        rows.append(jnp.stack(cols, axis=-1))
    return jnp.stack(rows, axis=-2)                              # (N, C, s, s)


def psp_module_reference(x, branch_params, conv_w, conv_b):
    N, C, H, W = x.shape
    Co = conv_w.shape[0]
    conv_w2d = conv_w.reshape(Co, 2 * C)
    ups = []
    for s, p in zip(POOL_SIZES, branch_params):
        pooled = _adaptive_avg_pool(x, s)
        y = jnp.einsum('ncij,oc->noij', pooled, p['w'])
        if p['bias'] is not None:
            y = y + p['bias'][None, :, None, None]
        if p['bn'] is not None:
            bn = p['bn']
            inv = jax.lax.rsqrt(bn['var'] + bn['eps'])
            y = (y - bn['mean'][None, :, None, None]) * (bn['gamma'] * inv)[None, :, None, None] \
                + bn['beta'][None, :, None, None]
        y = jax.nn.relu(y)
        uh = _interp_matrix(H, s)
        uw = _interp_matrix(W, s)
        ups.append(jnp.einsum('hi,ncij,wj->nchw', uh, y, uw))
    cat = jnp.concatenate(ups + [x], axis=1)                     # (N, 2C, H, W)
    return jnp.einsum('nchw,oc->nohw', cat, conv_w2d) + conv_b[None, :, None, None]


if __name__ == "__main__":
    key = jax.random.PRNGKey(0)
    keys = jax.random.split(key, 16)

    N = 2
    C_in = 8                 # in_channels (divisible by len(POOL_SIZES) = 4)
    C_out = 8                # out_channels
    H = W = 16
    Cb = C_in // len(POOL_SIZES)

    x = jax.random.normal(keys[0], (N, C_in, H, W), dtype=jnp.float32)

    branch_params = []
    for i, s in enumerate(POOL_SIZES):
        kw, kb, kg, kbt, km, kv = jax.random.split(keys[1 + i], 6)
        w = jax.random.normal(kw, (Cb, C_in), dtype=jnp.float32) * 0.2
        if s == 1:
            # pool_size == 1 -> use_bathcnorm forced False -> conv bias, no BN
            branch_params.append(dict(
                w=w,
                bias=jax.random.normal(kb, (Cb,), jnp.float32) * 0.1,
                bn=None))
        else:
            # Conv2dReLU(use_batchnorm=True): no conv bias, BN (eval mode stats)
            branch_params.append(dict(
                w=w, bias=None,
                bn=dict(gamma=1.0 + 0.1 * jax.random.normal(kg, (Cb,), jnp.float32),
                        beta=0.1 * jax.random.normal(kbt, (Cb,), jnp.float32),
                        mean=0.1 * jax.random.normal(km, (Cb,), jnp.float32),
                        var=jax.nn.softplus(jax.random.normal(kv, (Cb,), jnp.float32)) + 0.5,
                        eps=1e-5)))

    conv_w = jax.random.normal(keys[8], (C_out, 2 * C_in, 1, 1), jnp.float32) * 0.1
    conv_b = jax.random.normal(keys[9], (C_out,), jnp.float32) * 0.1

    ref = psp_module_reference(x, branch_params, conv_w, conv_b)

    # 1) auto tile selection (single spatial tile at this toy size), f32 streaming
    out = psp_module_forward(x, branch_params, conv_w, conv_b)
    out = jax.block_until_ready(out)
    assert out.shape == (N, C_out, H, W)
    assert jnp.allclose(out, ref, atol=1e-4, rtol=1e-4), "mismatch vs reference (auto tile)"

    # 2) explicit spatial tiling path
    out_t = psp_module_forward(x, branch_params, conv_w, conv_b, tile_spatial=128)
    out_t = jax.block_until_ready(out_t)
    assert jnp.allclose(out_t, ref, atol=1e-4, rtol=1e-4), "mismatch vs reference (tiled)"

    # 3) bf16 streaming (v6e/v7x traffic optimization), looser tolerance
    out_bf = psp_module_forward(x, branch_params, conv_w, conv_b,
                                stream_dtype=jnp.bfloat16)
    out_bf = jax.block_until_ready(out_bf)
    assert jnp.allclose(out_bf, ref, atol=5e-2, rtol=5e-2), "mismatch vs reference (bf16)"

    print("KERNEL_OK")
</pallas_src>

<mosaic_0001>
module attributes {stable_mosaic.version = 11 : i64} {
  func.func @psp_kernel(%arg0: i32, %arg1: i32, %arg2: memref<1x8x256xf32, #tpu.memory_space<vmem>>, %arg3: memref<50x256xf32, #tpu.memory_space<vmem>>, %arg4: memref<1x8x50xf32, #tpu.memory_space<vmem>>, %arg5: memref<8x8xf32, #tpu.memory_space<vmem>>, %arg6: memref<1x8x256xf32, #tpu.memory_space<vmem>>) attributes {dimension_semantics = [#tpu.dimension_semantics<parallel>, #tpu.dimension_semantics<parallel>], iteration_bounds = array<i64: 1, 2>, scalar_prefetch = 0 : i64, scratch_operands = 0 : i64, tpu.core_type = #tpu.core_type<tc>, window_params = [{transform_indices = @transform_0, window_bounds = array<i64: 1, 8, 256>}, {transform_indices = @transform_1, window_bounds = array<i64: 50, 256>}, {transform_indices = @transform_2, window_bounds = array<i64: 1, 8, 50>}, {pipeline_mode = #tpu.pipeline_mode<synchronous>, transform_indices = @transform_3, window_bounds = array<i64: 8, 8>}, {transform_indices = @transform_4, window_bounds = array<i64: 1, 8, 256>}]} {
    %c0 = arith.constant 0 : index
    %c0_0 = arith.constant 0 : index
    %c0_1 = arith.constant 0 : index
    %0 = vector.load %arg4[%c0, %c0_0, %c0_1] : memref<1x8x50xf32, #tpu.memory_space<vmem>>, vector<1x8x50xf32>
    %1 = vector.shape_cast %0 : vector<1x8x50xf32> to vector<8x50xf32>
    %c0_2 = arith.constant 0 : index
    %c0_3 = arith.constant 0 : index
    %2 = vector.load %arg3[%c0_2, %c0_3] : memref<50x256xf32, #tpu.memory_space<vmem>>, vector<50x256xf32>
    %cst = arith.constant dense<0.000000e+00> : vector<8x256xf32>
    %3 = tpu.matmul %1, %2, %cst {dimension_numbers = #tpu.dot_dimension_numbers<[1], [0], [0], [1], [0, 0, 1, 1], [], []>} : vector<8x50xf32>, vector<50x256xf32>, vector<8x256xf32> -> vector<8x256xf32>
    %c0_4 = arith.constant 0 : index
    %c0_5 = arith.constant 0 : index
    %4 = vector.load %arg5[%c0_4, %c0_5] : memref<8x8xf32, #tpu.memory_space<vmem>>, vector<8x8xf32>
    %c0_6 = arith.constant 0 : index
    %c0_7 = arith.constant 0 : index
    %c0_8 = arith.constant 0 : index
    %5 = vector.load %arg2[%c0_6, %c0_7, %c0_8] : memref<1x8x256xf32, #tpu.memory_space<vmem>>, vector<1x8x256xf32>
    %6 = vector.shape_cast %5 : vector<1x8x256xf32> to vector<8x256xf32>
    %cst_9 = arith.constant dense<0.000000e+00> : vector<8x256xf32>
    %7 = tpu.matmul %4, %6, %cst_9 {dimension_numbers = #tpu.dot_dimension_numbers<[1], [0], [0], [1], [0, 0, 1, 1], [], []>} : vector<8x8xf32>, vector<8x256xf32>, vector<8x256xf32> -> vector<8x256xf32>
    %8 = arith.addf %3, %7 : vector<8x256xf32>
    %c0_10 = arith.constant 0 : index
    %c0_11 = arith.constant 0 : index
    %c0_12 = arith.constant 0 : index
    %9 = vector.load %arg6[%c0_10, %c0_11, %c0_12] : memref<1x8x256xf32, #tpu.memory_space<vmem>>, vector<1x8x256xf32>
    %10 = vector.shape_cast %9 : vector<1x8x256xf32> to vector<8x256xf32>
    %11 = vector.shape_cast %8 : vector<8x256xf32> to vector<1x8x256xf32>
    tpu.vector_store %arg6[%c0_10, %c0_11, %c0_12], %11 {strides = array<i32>} : memref<1x8x256xf32, #tpu.memory_space<vmem>>, vector<1x8x256xf32>,
    return
  }
  func.func @transform_0(%arg0: i32, %arg1: i32) -> (i32, i32, i32) {
    %c0_i32 = arith.constant 0 : i32
    %c0_i32_0 = arith.constant 0 : i32
    return %arg1, %c0_i32, %arg0 : i32, i32, i32
  }
  func.func @transform_1(%arg0: i32, %arg1: i32) -> (i32, i32) {
    %c0_i32 = arith.constant 0 : i32
    %c0_i32_0 = arith.constant 0 : i32
    return %c0_i32, %arg0 : i32, i32
  }
  func.func @transform_2(%arg0: i32, %arg1: i32) -> (i32, i32, i32) {
    %c0_i32 = arith.constant 0 : i32
    %c0_i32_0 = arith.constant 0 : i32
    %c0_i32_1 = arith.constant 0 : i32
    return %arg1, %c0_i32, %c0_i32_0 : i32, i32, i32
  }
  func.func @transform_3(%arg0: i32, %arg1: i32) -> (i32, i32) {
    %c0_i32 = arith.constant 0 : i32
    %c0_i32_0 = arith.constant 0 : i32
    %c0_i32_1 = arith.constant 0 : i32
    return %c0_i32, %c0_i32_0 : i32, i32
  }
  func.func @transform_4(%arg0: i32, %arg1: i32) -> (i32, i32, i32) {
    %c0_i32 = arith.constant 0 : i32
    %c0_i32_0 = arith.constant 0 : i32
    return %arg1, %c0_i32, %arg0 : i32, i32, i32
  }
}

</mosaic_0001>

<bundles_post_ra>
// kernel: tpu_custom_call.1
= control target key start
LH: loop header
LB: loop body
LE: loop exit
PB: predicated region body
PF: predicated region fallthrough
CT: control target
= control target key end

     0   :  { %s1205_s0 = inlined_call_operand.hbm [shape: f32[2,8,256], index: 0, kind: input, shape index: {}]   ;;  %s1206_s1 = inlined_call_operand.hbm [shape: f32[50,256], index: 1, kind: input, shape index: {}]   ;;  %s1207_s2 = inlined_call_operand.hbm [shape: f32[2,8,50], index: 2, kind: input, shape index: {}]   ;;  %s1208_s3 = inlined_call_operand.vmem [shape: f32[8,8], index: 3, kind: input, shape index: {}]   ;;  %s1209_s4 = inlined_call_operand.hbm [shape: f32[2,8,256], index: 4, kind: output, shape index: {}]  }
   0x1   :  { %1219 = sst [smem:[#allocation15_spill]] %s1205_s0 }
   0x2   :  { %9 = vsyncpa [#allocation3], 0 }
   0x3   :  { %11 = vsyncpa [#allocation3 + $0x1], 0 }
   0x4   :  { %12 = vsyncpa [#allocation6], 0 }
   0x5   :  { %13 = vsyncpa [#allocation4], 0 }
   0x6   :  { %15 = vsyncpa [#allocation4 + $0x1], 0  ;;  %s935_s15 = smov 0   ;;  %s937_s16 = smov 0  }
   0x7   :  { %s939_s17 = smov 0   ;;  %s941_s18 = smov 0  }
   0x8   :  { %s943_s19 = smov 0   ;;  %s945_s20 = smov 0  }
   0x9 LB: > { %1220 = sst [smem:[#allocation13_spill]] %s897_s19  ;;  %s30_s21 = sadd.s32 1, %s897_s19  ;;  %s901_s20 = sphi %s945_s20, %s21_s20   ;;  %s897_s19 = sphi %s943_s19, %s1240_s19   ;;  %s893_s18 = sphi %s941_s18, %s1239_s18   ;;  %s889_s17 = sphi %s939_s17, %s1243_s17   ;;  %s885_s16 = sphi %s937_s16, %s1242_s16   ;;  %s881_s15 = sphi %s935_s15, %s1241_s15  }
   0xa   : > { %s42_s22 = sadd.s32 1, %s889_s17  ;;  %p31_p0 = scmp.ge.s32.totalorder %s30_s21, 2 }
   0xb   : > { %p49_p1 = scmp.ne.s32.totalorder %s889_s17, %s885_s16  ;;  %p50_p2 = scmp.eq.s32.totalorder %s901_s20, 0 }
   0xc   : > { %s1245_s21 = smov (%p31_p0, %s30_s21), 0  ;;  %p668_p5 = scmp.lt.s32.totalorder %s901_s20, 2 }
   0xd   : > { %1221 = sst [smem:[#allocation14_spill]] %s1245_s21  ;;  %p51_p4 = por %p50_p2, %p49_p1 }
   0xe   : > { %s37_s23 = ssub.s32 %s897_s19, %s1245_s21  ;;  %s199_s24 = sand.u32 1, %s901_s20  }
   0xf   : > { %p40_p6 = scmp.eq.s32.totalorder %s37_s23, 0  ;;  %s201_s25 = sand.u32 1, %s889_s17  }
  0x10   : > { %s626_s26 = sshll.u32 %s897_s19, 8  ;;  %s607_s28 = sshll.u32 %s201_s25, 4 }
  0x11   : > { %s983_s27 = scalar_select %p40_p6, %s889_s17, %s42_s22  }
  0x12   : > { %s1222_s0 = sld [smem:[#allocation15_spill]]  ;;  %p992_p7 = pnand %p668_p5, %p51_p4 }
  0x13   : > { %s203_s7 = scalar_lea.vmem [#allocation2], %s607_s28  ;;  %s998_s9 = scalar_lea.sflag [#allocation3], %s199_s24 }
  0x14   : > { %s1223_s6 = scalar_select %p992_p7, 1, 0 }
  0x15   : > { %s213_s8 = sshll.u32 %s203_s7, 4  ;;  %p1213_p9 = pneg %p992_p7  ;;  %s996_s8 = int_to_ptr.vmem [resolvable:$true] %s213_s8 }
  0x18   : > { %s990_s5 = scalar_lea.hbm %s1222_s0, %s626_s26  ;;  %s728_s13 = scalar_lea.hbm %s1222_s0, 512 }
  0x19   : > { %s723_s10 = scalar_lea.hbm %s990_s5, 256  ;;  %p729_p12 = scmp.lt.u32.totalorder %s990_s5, %s1222_s0 }
  0x1a   : > { %p724_p8 = scmp.ne.s32.totalorder %s990_s5, %s723_s10  ;;  %p730_p13 = scmp.lt.u32.totalorder %s728_s13, %s723_s10 }
  0x1b   : > { %p732_p2 = scmp.lt.u32.totalorder %s723_s10, %s990_s5 }
  0x1c   : > { %p726_p10 = pnand %p1213_p9, %p724_p8  ;;  %p731_p0 = por %p730_p13, %p729_p12 }
  0x1e   : > { %p727_p11 = pneg %p726_p10  ;;  %p733_p4 = por %p732_p2, %p731_p0 }
  0x20   : > { %p734_p5 = pnand %p733_p4, %p727_p11 }
  0x22   : > { %737 = shalt.err (!%p734_p5)
}
  0x23   : > { %s738_s23 = scalar_lea.vmem %s996_s8, 256  ;;  %s903_s24 = smov [#allocation2]  }
  0x24   : > { %p739_p6 = scmp.ne.s32.totalorder %s996_s8, %s738_s23  ;;  %s743_s26 = sshll.u32 %s903_s24, 4  ;;  %s744_s26 = int_to_ptr.vmem [resolvable:$false] %s743_s26 }
  0x25   : > { %s745_s28 = scalar_lea.vmem %s744_s26, 512  ;;  %p746_p3 = scmp.lt.s32.totalorder %s996_s8, %s744_s26 }
  0x26   : > { %p741_p8 = pnand %p739_p6, %p1213_p9  ;;  %p747_p12 = scmp.lt.s32.totalorder %s745_s28, %s738_s23 }
  0x28   : > { %p742_p10 = pneg %p741_p8  ;;  %p748_p13 = por %p747_p12, %p746_p3 }
  0x2a   : > { %p749_p0 = pnand %p748_p13, %p742_p10 }
  0x2c   : > { %752 = shalt.err (!%p749_p0)
}
  0x2d   : > { %659 = dma.hbm_to_vmem [thread:$0]  (!%p992_p7), %s990_s5, 256, %s996_s8, %s998_s9  }
  0x2e   : > { %s1027_s29 = sadd.s32 4294967295, %s901_s20   ;;  %s603_s30 = sadd.s32 4294967294, %s901_s20  }
  0x2f   : > { %p55_p3 = scmp.ne.s32.totalorder %s885_s16, %s881_s15  ;;  %p1212_p11 = scmp.eq.s32.totalorder %s1027_s29, 0 }
  0x30   : > { %p154_p2 = scmp.eq.s32.totalorder %s1027_s29, 1  ;;  %p160_p4 = scmp.eq.s32.totalorder %s603_s30, 1 }
  0x31   : > { %p1036_p5 = por %p1212_p11, %p55_p3  ;;  %p604_p6 = scmp.ge.s32.totalorder %s901_s20, 1 }
  0x32   : > { %p1044_p8 = por %p154_p2, %p49_p1  ;;  %p1048_p10 = por %p160_p4, %p55_p3 }
  0x33   : > { %s1224_s7 = scalar_select %p1036_p5, 1, 0 }
  0x34   : > { %s1225_s5 = scalar_select %p1044_p8, 1, 0 }
  0x35   : > { %s1226_s8 = scalar_select %p1048_p10, 1, 0 }
  0x36   : > { %p167_p12 = scmp.lt.s32.totalorder %s901_s20, 3  ;;  %s610_s10 = sshll.u32 %s201_s25, 3 }
  0x37   : > { %s904_s12 = smov [#allocation5]   ;;  %s611_s14 = sshll.u32 %s897_s19, 7 }
  0x38   : > { %p1055_p13 = pnand %p604_p6, %p167_p12  ;;  %s182_s13 = sshll.u32 %s904_s12, 4  ;;  %s1059_s13 = int_to_ptr.vmem [resolvable:$true] %s182_s13 }
  0x39   : > { %s224_s22 = scalar_lea.vmem [#allocation7], %s610_s10  ;;  %s1073_s28 = scalar_lea.hbm %s1207_s2, %s611_s14 }
  0x3a   : > { %s1227_s11 = scalar_select %p1055_p13, 1, 0 }
  0x3b   : > { %p652_p1 = pneg %p1055_p13  ;;  %s231_s23 = sshll.u32 %s224_s22, 4  ;;  %s1075_s23 = int_to_ptr.vmem [resolvable:$true] %s231_s23 }
  0x3c   : > { %s753_s0 = scalar_lea.hbm %s1206_s1, 1792 }
  0x3d   : > { %p1066_p0 = pnand %p652_p1, %p1212_p11  ;;  %p754_p3 = scmp.ne.s32.totalorder %s1206_s1, %s753_s0 }
  0x3e   : > { %p760_p12 = scmp.lt.u32.totalorder %s753_s0, %s1206_s1 }
  0x3f   : > { %p755_p2 = pneg %p1066_p0 }
  0x41   : > { %p756_p4 = pnand %p755_p2, %p754_p3 }
  0x43   : > { %p757_p6 = pneg %p756_p4 }
  0x45   : > { %p762_p1 = pnand %p760_p12, %p757_p6 }
  0x47   : > { %765 = shalt.err (!%p762_p1)
}
  0x48   : > { %s766_s14 = scalar_lea.vmem %s1059_s13, 1792  ;;  %p774_p8 = scmp.lt.s32.totalorder %s1059_s13, %s1059_s13 }
  0x49   : > { %p767_p11 = scmp.ne.s32.totalorder %s1059_s13, %s766_s14  ;;  %p775_p5 = scmp.lt.s32.totalorder %s766_s14, %s766_s14 }
  0x4b   : > { %p769_p9 = pnand %p767_p11, %p755_p2  ;;  %p776_p13 = por %p775_p5, %p774_p8 }
  0x4d   : > { %p770_p10 = pneg %p769_p9 }
  0x4f   : > { %p777_p7 = pnand %p776_p13, %p770_p10 }
  0x51   : > { %780 = shalt.err (!%p777_p7)
}
  0x52   : > { %s905_s21 = smov 256   ;;  %s906_s0 = smov 16  }
  0x53   : > { %655 = dma.hbm_to_vmem [thread:$0]  (!%p1066_p0), %s1206_s1, 1792, %s1059_s13, [#allocation6], %s905_s21, %s905_s21, %s906_s0  }
  0x54   : > { %s781_s26 = scalar_lea.hbm %s1073_s28, 128  ;;  %p1229_p11 = scmp.ne.s32.totalorder %s1223_s6, 0 }
  0x55   : > { %p782_p9 = scmp.ne.s32.totalorder %s1073_s28, %s781_s26  ;;  %s786_s10 = scalar_lea.hbm %s1207_s2, 256 }
  0x56   : > { %p1230_p5 = pneg %p1229_p11  ;;  %p787_p10 = scmp.lt.u32.totalorder %s1073_s28, %s1207_s2 }
  0x57   : > { %p788_p13 = scmp.lt.u32.totalorder %s786_s10, %s781_s26  ;;  %p790_p2 = scmp.lt.u32.totalorder %s781_s26, %s1073_s28 }
  0x58   : > { %p784_p8 = pnand %p782_p9, %p1230_p5 }
  0x59   : > { %p789_p3 = por %p788_p13, %p787_p10 }
  0x5a   : > { %p785_p7 = pneg %p784_p8 }
  0x5b   : > { %p791_p4 = por %p790_p2, %p789_p3 }
  0x5d   : > { %p792_p6 = pnand %p791_p4, %p785_p7 }
  0x5f   : > { %795 = shalt.err (!%p792_p6)
}
  0x60   : > { %s796_s13 = scalar_lea.vmem %s1075_s23, 128  ;;  %p1231_p12 = pmov %p1230_p5 }
  0x61   : > { %p797_p0 = scmp.ne.s32.totalorder %s1075_s23, %s796_s13  ;;  %s907_s24 = smov [#allocation7]  }
  0x62   : > { %s801_s21 = sshll.u32 %s907_s24, 4  ;;  %s802_s21 = int_to_ptr.vmem [resolvable:$false] %s801_s21 }
  0x63   : > { %p799_p1 = pnand %p797_p0, %p1231_p12  ;;  %s803_s0 = scalar_lea.vmem %s802_s21, 256 }
  0x64   : > { %p804_p5 = scmp.lt.s32.totalorder %s1075_s23, %s802_s21  ;;  %p805_p8 = scmp.lt.s32.totalorder %s803_s0, %s796_s13 }
  0x65   : > { %p800_p9 = pneg %p799_p1 }
  0x66   : > { %p806_p10 = por %p805_p8, %p804_p5 }
  0x68   : > { %p807_p13 = pnand %p806_p10, %p800_p9 }
  0x6a   : > { %810 = shalt.err (!%p807_p13)
}
  0x6b   : > { %662 = dma.hbm_to_vmem [thread:$0]  (!%p1229_p11), %s1073_s28, 128, %s1075_s23, %s998_s9  }
  0x6c   : > { %p1232_p7 = scmp.ne.s32.totalorder %s1227_s11, 0 }
  0x6d   : > { %s242_s19 = sand.u32 (!%p1232_p7), 1, %s1027_s29   ;;  %s1126_s25 = sand.u32 (!%p1232_p7), 1, %s885_s16  }
  0x6e   : > { %240 = sbr.rel (%p1232_p7) target bundleno = 370 (0x172), region = 36  ;;  %s613_s26 = sshll.u32 (!%p1232_p7), %s1126_s25, 4 }
  0x6f   : > { %s243_s30 = scalar_lea.sflag (!%p1232_p7), [#allocation3], %s242_s19  ;;  %s246_s12 = scalar_lea.vmem (!%p1232_p7), [#allocation2], %s613_s26 }
  0x70   : > { %p1233_p3 = scmp.ne.s32.totalorder (!%p1232_p7), %s1224_s7, 0 }
  0x75   : > { %864 = dma.done.wait (%p1233_p3), %s243_s30, 256  }
  0x76   : > { %866 = vsyncadd (%p1233_p3), %s243_s30, 4294967040  ;;  %p1234_p11 = scmp.eq.s32.totalorder %s1027_s29, 0 }
  0x78   : > { %868 = dma.done.wait (%p1234_p11), [#allocation6], 1792   ;;  %p1235_p2 = pmov %p1234_p11 }
  0x79   : > { %s615_s6 = sshll.u32 %s1126_s25, 3 }
  0x7a   : > { %870 = vsyncadd (%p1235_p2), [#allocation6], 4294965504  ;;  %s1140_s9 = scalar_lea.vmem [#allocation7], %s615_s6 }
  0x7b   : > { %872 = dma.done.wait (%p1233_p3), %s243_s30, 128  }
  0x7c   : > { %874 = vsyncadd (%p1233_p3), %s243_s30, 4294967168  ;;  %v908_v0 = vmov 0.0   ;;  %v294_v1 = vld [vmem:[#allocation5 + $0x8] sm:$0xff]  ;;  %v296_v2 = vld [vmem:[#allocation5 + $0x18] sm:$0xff]  ;;  %vm310_vm0 = vcmask 64512   ;;  %vm389_vm1 = vcmask 1041408  }
  0x7d   : > { %378 = vmatprep.mubr.f32.mxu1 %v908_v0  ;;  %460 = vmatprep.mubr.f32.mxu0 %v908_v0  ;;  %v293_v3 = vld [vmem:[#allocation5] sm:$0xff]  ;;  %v628_v4 = vpack.c.bf16 %v296_v2, %v294_v1  ;;  %v295_v5 = vld [vmem:[#allocation5 + $0x10] sm:$0xff]  ;;  %v298_v6 = vld [vmem:[#allocation5 + $0x28] sm:$0xff]  ;;  %vm385_vm2 = vcmask 408576   ;;  %s627_s11 = sshll.u32 %s893_s18, 8  ;;  %s288_s23 = scalar_lea.vmem [#allocation8], %s613_s26 }
  0x7e   : > { %v300_v7 = vld [vmem:[#allocation5 + $0x38] sm:$0xff]  ;;  %v630_v8 = vpack.c.bf16 %v295_v5, %v293_v3  ;;  %v297_v10 = vld [vmem:[#allocation5 + $0x20] sm:$0xff]  ;;  %v299_v11 = vld [vmem:[#allocation5 + $0x30] sm:$0xff]  ;;  %s486_s28 = sshll.u32 %s288_s23, 4  ;;  %s1156_s14 = scalar_lea.hbm %s1209_s4, %s627_s11  ;;  %s1158_s28 = int_to_ptr.vmem [resolvable:$true] %s486_s28 }
  0x7f   : > { %v632_v9 = vpack.c.bf16 %v300_v7, %v298_v6  ;;  %v302_v12 = vld [vmem:[#allocation5 + $0x48] sm:$0xff]  ;;  %629 = vmatprep.subr.bf16.mxu0 %v628_v4  ;;  %v304_v13 = vld [vmem:[#allocation5 + $0x58] sm:$0xff]  ;;  %v634_v14 = vpack.c.bf16 %v299_v11, %v297_v10  ;;  %v308_v16 = vld [vmem:[%s246_s12] sm:$0xff]  ;;  %s470_s18 = scalar_lea.sflag [#allocation4], %s1126_s25  ;;  %s811_s13 = scalar_lea.vmem %s1158_s28, 256 }
  0x80   : > { %631 = vmatpush1.bf16.msra.mxu0 %v630_v8  ;;  %v309_v15 = vld [vmem:[%s246_s12 + $0x8] sm:$0xff]  ;;  %v636_v17 = vpack.c.bf16 %v304_v13, %v302_v12  ;;  %v301_v18 = vld [vmem:[#allocation5 + $0x40] sm:$0xff]  ;;  %v303_v19 = vld [vmem:[#allocation5 + $0x50] sm:$0xff]  ;;  %p812_p4 = scmp.ne.s32.totalorder %s1158_s28, %s811_s13  ;;  %p1236_p6 = scmp.ne.s32.totalorder %s1225_s5, 0 }
  0x81   : > { %633 = vmatprep.subr.bf16.mxu0 %v632_v9  ;;  %314 = vmatprep.subr.mxu1 %v309_v15  ;;  %v307_v20 = vld [vmem:[%s1208_s3] sm:$0xff]  ;;  %v638_v21 = vpack.c.bf16 %v303_v19, %v301_v18  ;;  %v306_v22 = vld [vmem:[#allocation5 + $0x68] sm:$0x3]  ;;  %v292_v24 = vld [vmem:[%s1140_s9] sm:$0xff]  ;;  %s909_s24 = smov [#allocation8]  }
  0x82   : > { %315 = vmatpush1.msra.mxu1 %v308_v16  ;;  %v305_v23 = vld [vmem:[#allocation5 + $0x60] sm:$0x3]  ;;  %p813_p0 = pnand %p812_p4, %p1236_p6  ;;  %s815_s21 = sshll.u32 %s909_s24, 4  ;;  %s816_s21 = int_to_ptr.vmem [resolvable:$false] %s815_s21 }
  0x83   : > { %617 = vmatmul.mubr.msk.f32.vlgmr.msra.gmra.mrb[0].mxu1 %vm310_vm0, %v307_v20  ;;  %s817_s0 = scalar_lea.vmem %s816_s21, 512  ;;  %p818_p1 = scmp.lt.s32.totalorder %s1158_s28, %s816_s21 }
  0x84   : > { %635 = vmatpush1.bf16.msra.mxu0 %v634_v14  ;;  %p814_p12 = pneg %p813_p0  ;;  %p819_p9 = scmp.lt.s32.totalorder %s817_s0, %s811_s13 }
  0x85   : > { %637 = vmatprep.subr.bf16.mxu0 %v636_v17 }
  0x86   : > { %p820_p5 = por %p819_p9, %p818_p1 }
  0x88   : > { %639 = vmatpush1.bf16.msra.mxu0 %v638_v21  ;;  %p821_p8 = pnand %p820_p5, %p814_p12 }
  0x89   : > { %618 = vmatprep.subr.msk.mxu0 %vm389_vm1, %v306_v22 }
  0x8c   : > { %619 = vmatpush1.msk.msra.mxu0 %vm389_vm1, %v305_v23 }
  0x8d   : > { %620 = vmatmul.mubr.msk.f32.vlgmr.msra.gmra.mrb[0].mxu0 %vm385_vm2, %v292_v24 }
 0x156   : > { %v380_v25 = vpop.f32.mrb[0].mxu1 }
 0x157   : > { %v382_v26 = vpop.f32.mrb[1].mxu1 }
 0x160   : > { %v462_v27 = vpop.f32.mrb[0].mxu0 }
 0x161   : > { %v463_v28 = vadd.f32 %v462_v27, %v380_v25  ;;  %v464_v29 = vpop.f32.mrb[1].mxu0 }
 0x162   : > { %v465_v30 = vadd.f32 %v464_v29, %v382_v26 }
 0x163   : > { %467 = vst [vmem:[%s288_s23] sm:$0xff] %v463_v28 }
 0x164   : > { %468 = vst [vmem:[%s288_s23 + $0x8] sm:$0xff] %v465_v30 }
 0x165   : > { %824 = shalt.err (!%p821_p8)
}
 0x166   : > { %s825_s19 = scalar_lea.hbm %s1156_s14, 256  ;;  %s829_s30 = scalar_lea.hbm %s1209_s4, 512 }
 0x167   : > { %p826_p10 = scmp.ne.s32.totalorder %s1156_s14, %s825_s19  ;;  %p830_p3 = scmp.lt.u32.totalorder %s1156_s14, %s1209_s4 }
 0x168   : > { %p831_p11 = scmp.lt.u32.totalorder %s829_s30, %s825_s19  ;;  %p833_p4 = scmp.lt.u32.totalorder %s825_s19, %s1156_s14 }
 0x169   : > { %p827_p13 = pnand %p826_p10, %p1236_p6 }
 0x16a   : > { %p832_p2 = por %p831_p11, %p830_p3 }
 0x16b   : > { %p828_p7 = pneg %p827_p13 }
 0x16c   : > { %p834_p0 = por %p833_p4, %p832_p2 }
 0x16e   : > { %p835_p12 = pnand %p834_p0, %p828_p7 }
 0x170   : > { %838 = shalt.err (!%p835_p12)
}
 0x171   : > { %650 = dma.vmem_to_hbm [thread:$0]  (%p1236_p6), %s1158_s28, 256, %s1156_s14, %s470_s18  }
 0x172 PF: > { %s498_s9 = sand.u32 1, %s881_s15   ;;  %p1237_p1 = scmp.ne.s32.totalorder %s1226_s8, 0 }
 0x173   : > { %p1238_p9 = scmp.ge.s32.totalorder %s901_s20, 2  ;;  %s499_s29 = scalar_lea.sflag [#allocation4], %s498_s9 }
 0x175   : > { %p664_p5 = pnand %p1238_p9, %p1237_p1 }
 0x177   : > { %876 = dma.done.wait (!%p664_p5), %s499_s29, 256  }
 0x178   : > { %878 = vsyncadd (!%p664_p5), %s499_s29, 4294967040  ;;  %s21_s20 = sadd.s32 1, %s901_s20   ;;  %s1239_s18 = sld [smem:[#allocation13_spill]] }
 0x179   : > { %p18_p8 = scmp.ge.s32.totalorder %s21_s20, 4   ;;  %s1240_s19 = sld [smem:[#allocation14_spill]] }
 0x17a   : > { %s1241_s15 = smov %s885_s16  ;;  %s1242_s16 = smov %s889_s17 }
 0x17b   : > { %s1243_s17 = smov %s983_s27  ;;  %20 = sbr.rel (!%p18_p8) target bundleno = 9 (0x9), region = 97 }
 0x182   :  { %504 = vsyncpa [#allocation3], 1 }
 0x183   :  { %506 = vsyncpa [#allocation3 + $0x1], 1 }
 0x184   :  { %507 = vsyncpa [#allocation6], 1 }
 0x185   :  { %508 = vsyncpa [#allocation4], 1 }
 0x186   :  { %510 = vsyncpa [#allocation4 + $0x1], 1 }

</bundles_post_ra>
